<compile_context>
chip_gen: v6e
topology: v6e:2x2x1
jax: 0.10.0
libtpu: 0.0.40
codegen_flags: <defaults>
</compile_context>

<pallas_src>
import jax
import jax.numpy as jnp
from jax.experimental import pallas as pl
from jax.experimental.pallas import tpu as pltpu


# ---------------------------------------------------------------------------
# Model hyper-parameters (small, consistent with the module's __init__)
# ---------------------------------------------------------------------------
INPUT_DIM = 16
LATENT_DIM = 8
CONDITION_DIM = 4
HIDDEN_LAYERS = (32, 16)          # encoder: 16->32->16, decoder mirrors it
BATCH = 8
# activation_function = nn.ReLU()

IN_COLS = LATENT_DIM + INPUT_DIM + CONDITION_DIM     # packed input [eps|x|cond]


def _round8(n):
    return -(-n // 8) * 8


# ---------------------------------------------------------------------------
# Weight-slab layout: all 12 weight/bias blocks packed into ONE (48, 128) f32
# slab, arranged in four 32-lane column bands (greedy balanced bin-packing),
# each block starting at an 8-aligned row offset within its band.
# ---------------------------------------------------------------------------
_BLOCKS = (
    ("ew0", INPUT_DIM, HIDDEN_LAYERS[0]),
    ("eb0", 1, HIDDEN_LAYERS[0]),
    ("ew1", HIDDEN_LAYERS[0], HIDDEN_LAYERS[1]),
    ("eb1", 1, HIDDEN_LAYERS[1]),
    ("hw",  HIDDEN_LAYERS[1], 2 * LATENT_DIM),        # [muw | lvw]
    ("hb",  1, 2 * LATENT_DIM),                       # [mub | lvb]
    ("dw0", LATENT_DIM + CONDITION_DIM, HIDDEN_LAYERS[1]),
    ("db0", 1, HIDDEN_LAYERS[1]),
    ("dw1", HIDDEN_LAYERS[1], HIDDEN_LAYERS[0]),
    ("db1", 1, HIDDEN_LAYERS[0]),
    ("dw2", HIDDEN_LAYERS[0], INPUT_DIM),
    ("db2", 1, INPUT_DIM),
)

_BAND_WIDTH = 32                          # widest block is 32 columns
_NUM_BANDS = 128 // _BAND_WIDTH

_band_heights = [0] * _NUM_BANDS
_OFFSETS = {}                             # name -> (row0, col0, rows, cols)
for _name, _rows, _cols in sorted(_BLOCKS, key=lambda t: -_round8(t[1])):
    _b = min(range(_NUM_BANDS), key=lambda i: _band_heights[i])
    _OFFSETS[_name] = (_band_heights[_b], _b * _BAND_WIDTH, _rows, _cols)
    _band_heights[_b] += _round8(_rows)
SLAB_ROWS = _round8(max(_band_heights))   # 48
SLAB_COLS = 128


def pack_params(p):
    """Pack the param dict into a single (SLAB_ROWS, 128) f32 slab."""
    slab = jnp.zeros((SLAB_ROWS, SLAB_COLS), jnp.float32)
    for name, (r0, c0, rows, cols) in _OFFSETS.items():
        slab = slab.at[r0:r0 + rows, c0:c0 + cols].set(p[name].astype(jnp.float32))
    return slab


# ---------------------------------------------------------------------------
# Kernel
# ---------------------------------------------------------------------------
def cvae_kernel(in_ref, slab_ref, recon_ref, mu_ref, logvar_ref):
    f32 = jnp.float32
    slab = slab_ref[...]                               # 6 vregs, stays resident

    def w(name):
        r0, c0, rows, cols = _OFFSETS[name]
        return slab[r0:r0 + rows, c0:c0 + cols]        # static slice

    xin = in_ref[...]                                  # (tile, 28) = [eps|x|cond]
    eps  = xin[:, :LATENT_DIM]
    x    = xin[:, LATENT_DIM:LATENT_DIM + INPUT_DIM]
    cond = xin[:, LATENT_DIM + INPUT_DIM:]

    # ----- encoder -----
    h = jnp.maximum(jnp.dot(x, w("ew0"), preferred_element_type=f32) + w("eb0"), 0.0)
    h = jnp.maximum(jnp.dot(h, w("ew1"), preferred_element_type=f32) + w("eb1"), 0.0)

    # ----- merged mu/logvar head (single matmul, split in lanes) -----
    head = jnp.dot(h, w("hw"), preferred_element_type=f32) + w("hb")
    mu = head[:, :LATENT_DIM]
    logvar = head[:, LATENT_DIM:]

    # ----- reparameterize (eps and mu both start at lane 0) -----
    z = mu + eps * jnp.exp(0.5 * logvar)

    # ----- decoder -----
    # cat([z, cond], dim=1) @ W0 == z @ W0[:latent] + cond @ W0[latent:]
    dw0 = w("dw0")
    d = jnp.maximum(
        jnp.dot(z, dw0[:LATENT_DIM], preferred_element_type=f32)
        + jnp.dot(cond, dw0[LATENT_DIM:], preferred_element_type=f32)
        + w("db0"), 0.0)
    d = jnp.maximum(jnp.dot(d, w("dw1"), preferred_element_type=f32) + w("db1"), 0.0)
    recon = jnp.dot(d, w("dw2"), preferred_element_type=f32) + w("db2")

    # three direct stores — no post-kernel unpack slices needed
    recon_ref[...] = recon
    mu_ref[...] = mu
    logvar_ref[...] = logvar


# ---------------------------------------------------------------------------
# Wrapper
# ---------------------------------------------------------------------------
def cvae_forward(x, condition, eps, slab, *, tile_rows=4096):
    batch = x.shape[0]
    packed_in = jnp.concatenate(
        [eps.astype(jnp.float32), x.astype(jnp.float32),
         condition.astype(jnp.float32)], axis=1)                 # (B, 28)

    # Balanced tiling: pick the grid first, then the smallest 8-aligned tile
    # that covers the batch (minimizes padding waste). Force an even grid of
    # >= 2 steps when there is enough work so v7x's second TC gets a share.
    grid_n = max(1, -(-batch // max(8, tile_rows)))
    if grid_n == 1 and batch > 8:
        grid_n = 2
    elif grid_n > 1 and grid_n % 2:
        grid_n += 1
    tile = _round8(-(-batch // grid_n))
    padded = grid_n * tile
    if padded != batch:
        packed_in = jnp.pad(packed_in, ((0, padded - batch), (0, 0)))

    recon, mu, logvar = pl.pallas_call(
        cvae_kernel,
        out_shape=(
            jax.ShapeDtypeStruct((padded, INPUT_DIM), jnp.float32),
            jax.ShapeDtypeStruct((padded, LATENT_DIM), jnp.float32),
            jax.ShapeDtypeStruct((padded, LATENT_DIM), jnp.float32),
        ),
        grid_spec=pltpu.PrefetchScalarGridSpec(
            num_scalar_prefetch=0,
            grid=(grid_n,),
            in_specs=[
                pl.BlockSpec((tile, IN_COLS), lambda i: (i, 0)),
                # weight slab: constant block index -> stays VMEM-resident
                pl.BlockSpec((SLAB_ROWS, SLAB_COLS), lambda i: (0, 0)),
            ],
            out_specs=[
                pl.BlockSpec((tile, INPUT_DIM), lambda i: (i, 0)),
                pl.BlockSpec((tile, LATENT_DIM), lambda i: (i, 0)),
                pl.BlockSpec((tile, LATENT_DIM), lambda i: (i, 0)),
            ],
        ),
        compiler_params=pltpu.CompilerParams(
            dimension_semantics=("parallel",)),   # megacore sharding on v7x
    )(packed_in, slab)

    if padded != batch:
        recon, mu, logvar = recon[:batch], mu[:batch], logvar[:batch]
    return recon, mu, logvar


# ---------------------------------------------------------------------------
# Params + pure-JAX reference
# ---------------------------------------------------------------------------
def init_params(key):
    """Deterministic PyTorch-Linear-style init; weights stored as (in, out)."""
    def linear(key, fan_in, fan_out):
        kw, kb = jax.random.split(key)
        bound = 1.0 / jnp.sqrt(float(fan_in))
        w = jax.random.uniform(kw, (fan_in, fan_out), jnp.float32, -bound, bound)
        b = jax.random.uniform(kb, (1, fan_out), jnp.float32, -bound, bound)
        return w, b

    keys = jax.random.split(key, 8)
    ew0, eb0 = linear(keys[0], INPUT_DIM, HIDDEN_LAYERS[0])
    ew1, eb1 = linear(keys[1], HIDDEN_LAYERS[0], HIDDEN_LAYERS[1])
    muw, mub = linear(keys[2], HIDDEN_LAYERS[1], LATENT_DIM)
    lvw, lvb = linear(keys[3], HIDDEN_LAYERS[1], LATENT_DIM)
    dw0, db0 = linear(keys[4], LATENT_DIM + CONDITION_DIM, HIDDEN_LAYERS[1])
    dw1, db1 = linear(keys[5], HIDDEN_LAYERS[1], HIDDEN_LAYERS[0])
    dw2, db2 = linear(keys[6], HIDDEN_LAYERS[0], INPUT_DIM)

    return {
        "ew0": ew0, "eb0": eb0, "ew1": ew1, "eb1": eb1,
        "hw": jnp.concatenate([muw, lvw], axis=1),   # merged mu/logvar head
        "hb": jnp.concatenate([mub, lvb], axis=1),
        "dw0": dw0, "db0": db0, "dw1": dw1, "db1": db1, "dw2": dw2, "db2": db2,
    }


def cvae_forward_ref(x, condition, eps, p):
    """Pure-JAX reference mirroring the PyTorch forward."""
    h = jnp.maximum(x @ p["ew0"] + p["eb0"], 0.0)
    h = jnp.maximum(h @ p["ew1"] + p["eb1"], 0.0)
    head = h @ p["hw"] + p["hb"]
    mu, logvar = head[:, :LATENT_DIM], head[:, LATENT_DIM:]
    z = mu + eps * jnp.exp(0.5 * logvar)
    combined = jnp.concatenate([z, condition], axis=1)
    d = jnp.maximum(combined @ p["dw0"] + p["db0"], 0.0)
    d = jnp.maximum(d @ p["dw1"] + p["db1"], 0.0)
    recon = d @ p["dw2"] + p["db2"]
    return recon, mu, logvar


if __name__ == "__main__":
    key = jax.random.PRNGKey(0)
    k_param, k_x, k_c, k_eps = jax.random.split(key, 4)

    params = init_params(k_param)
    slab = pack_params(params)

    # --- small demo batch ---
    x = jax.random.normal(k_x, (BATCH, INPUT_DIM), jnp.float32)
    condition = jax.random.normal(k_c, (BATCH, CONDITION_DIM), jnp.float32)
    eps = jax.random.normal(k_eps, (BATCH, LATENT_DIM), jnp.float32)

    recon, mu, logvar = jax.block_until_ready(
        cvae_forward(x, condition, eps, slab))

    r_ref, mu_ref, lv_ref = cvae_forward_ref(x, condition, eps, params)
    assert recon.shape == (BATCH, INPUT_DIM)
    assert mu.shape == (BATCH, LATENT_DIM) and logvar.shape == (BATCH, LATENT_DIM)
    assert jnp.allclose(recon, r_ref, atol=1e-5)
    assert jnp.allclose(mu, mu_ref, atol=1e-5)
    assert jnp.allclose(logvar, lv_ref, atol=1e-5)

    # --- larger, unaligned batch exercising the balanced 2-step grid path ---
    B2 = 300
    kx2, kc2, ke2 = jax.random.split(jax.random.PRNGKey(1), 3)
    x2 = jax.random.normal(kx2, (B2, INPUT_DIM), jnp.float32)
    c2 = jax.random.normal(kc2, (B2, CONDITION_DIM), jnp.float32)
    e2 = jax.random.normal(ke2, (B2, LATENT_DIM), jnp.float32)
    r2, m2, l2 = jax.block_until_ready(cvae_forward(x2, c2, e2, slab))
    r2r, m2r, l2r = cvae_forward_ref(x2, c2, e2, params)
    assert jnp.allclose(r2, r2r, atol=1e-5)
    assert jnp.allclose(m2, m2r, atol=1e-5)
    assert jnp.allclose(l2, l2r, atol=1e-5)

    print("KERNEL_OK")
</pallas_src>

<mosaic_0001>
module attributes {stable_mosaic.version = 11 : i64} {
  func.func @cvae_kernel(%arg0: i32, %arg1: memref<8x28xf32, #tpu.memory_space<vmem>>, %arg2: memref<48x128xf32, #tpu.memory_space<vmem>>, %arg3: memref<8x16xf32, #tpu.memory_space<vmem>>, %arg4: memref<8x8xf32, #tpu.memory_space<vmem>>, %arg5: memref<8x8xf32, #tpu.memory_space<vmem>>) attributes {dimension_semantics = [#tpu.dimension_semantics<parallel>], iteration_bounds = array<i64: 1>, scalar_prefetch = 0 : i64, scratch_operands = 0 : i64, tpu.core_type = #tpu.core_type<tc>, window_params = [{transform_indices = @transform_0, window_bounds = array<i64: 8, 28>}, {pipeline_mode = #tpu.pipeline_mode<synchronous>, transform_indices = @transform_1, window_bounds = array<i64: 48, 128>}, {transform_indices = @transform_2, window_bounds = array<i64: 8, 16>}, {transform_indices = @transform_3, window_bounds = array<i64: 8, 8>}, {transform_indices = @transform_4, window_bounds = array<i64: 8, 8>}]} {
    %c0 = arith.constant 0 : index
    %c0_0 = arith.constant 0 : index
    %0 = vector.load %arg2[%c0, %c0_0] : memref<48x128xf32, #tpu.memory_space<vmem>>, vector<48x128xf32>
    %c0_1 = arith.constant 0 : index
    %c0_2 = arith.constant 0 : index
    %1 = vector.load %arg1[%c0_1, %c0_2] : memref<8x28xf32, #tpu.memory_space<vmem>>, vector<8x28xf32>
    %2 = vector.extract_strided_slice %1 {offsets = [0, 0], sizes = [8, 8], strides = [1, 1]} : vector<8x28xf32> to vector<8x8xf32>
    %3 = vector.extract_strided_slice %1 {offsets = [0, 8], sizes = [8, 16], strides = [1, 1]} : vector<8x28xf32> to vector<8x16xf32>
    %4 = vector.extract_strided_slice %1 {offsets = [0, 24], sizes = [8, 4], strides = [1, 1]} : vector<8x28xf32> to vector<8x4xf32>
    %5 = vector.extract_strided_slice %0 {offsets = [0, 64], sizes = [16, 32], strides = [1, 1]} : vector<48x128xf32> to vector<16x32xf32>
    %cst = arith.constant dense<0.000000e+00> : vector<8x32xf32>
    %6 = tpu.matmul %3, %5, %cst {dimension_numbers = #tpu.dot_dimension_numbers<[1], [0], [0], [1], [0, 0, 1, 1], [], []>} : vector<8x16xf32>, vector<16x32xf32>, vector<8x32xf32> -> vector<8x32xf32>
    %7 = vector.extract_strided_slice %0 {offsets = [32, 0], sizes = [1, 32], strides = [1, 1]} : vector<48x128xf32> to vector<1x32xf32>
    %8 = vector.broadcast %7 : vector<1x32xf32> to vector<8x32xf32>
    %9 = arith.addf %6, %8 : vector<8x32xf32>
    %cst_3 = arith.constant 0.000000e+00 : f32
    %10 = vector.broadcast %cst_3 : f32 to vector<8x32xf32>
    %11 = arith.maximumf %9, %10 : vector<8x32xf32>
    %12 = vector.extract_strided_slice %0 {offsets = [0, 0], sizes = [32, 16], strides = [1, 1]} : vector<48x128xf32> to vector<32x16xf32>
    %cst_4 = arith.constant dense<0.000000e+00> : vector<8x16xf32>
    %13 = tpu.matmul %11, %12, %cst_4 {dimension_numbers = #tpu.dot_dimension_numbers<[1], [0], [0], [1], [0, 0, 1, 1], [], []>} : vector<8x32xf32>, vector<32x16xf32>, vector<8x16xf32> -> vector<8x16xf32>
    %14 = vector.extract_strided_slice %0 {offsets = [32, 32], sizes = [1, 16], strides = [1, 1]} : vector<48x128xf32> to vector<1x16xf32>
    %15 = vector.broadcast %14 : vector<1x16xf32> to vector<8x16xf32>
    %16 = arith.addf %13, %15 : vector<8x16xf32>
    %cst_5 = arith.constant 0.000000e+00 : f32
    %17 = vector.broadcast %cst_5 : f32 to vector<8x16xf32>
    %18 = arith.maximumf %16, %17 : vector<8x16xf32>
    %19 = vector.extract_strided_slice %0 {offsets = [0, 96], sizes = [16, 16], strides = [1, 1]} : vector<48x128xf32> to vector<16x16xf32>
    %cst_6 = arith.constant dense<0.000000e+00> : vector<8x16xf32>
    %20 = tpu.matmul %18, %19, %cst_6 {dimension_numbers = #tpu.dot_dimension_numbers<[1], [0], [0], [1], [0, 0, 1, 1], [], []>} : vector<8x16xf32>, vector<16x16xf32>, vector<8x16xf32> -> vector<8x16xf32>
    %21 = vector.extract_strided_slice %0 {offsets = [32, 64], sizes = [1, 16], strides = [1, 1]} : vector<48x128xf32> to vector<1x16xf32>
    %22 = vector.broadcast %21 : vector<1x16xf32> to vector<8x16xf32>
    %23 = arith.addf %20, %22 : vector<8x16xf32>
    %24 = vector.extract_strided_slice %23 {offsets = [0, 0], sizes = [8, 8], strides = [1, 1]} : vector<8x16xf32> to vector<8x8xf32>
    %25 = vector.extract_strided_slice %23 {offsets = [0, 8], sizes = [8, 8], strides = [1, 1]} : vector<8x16xf32> to vector<8x8xf32>
    %cst_7 = arith.constant 5.000000e-01 : f32
    %26 = vector.broadcast %cst_7 : f32 to vector<8x8xf32>
    %27 = arith.mulf %26, %25 : vector<8x8xf32>
    %28 = math.exp %27 : vector<8x8xf32>
    %29 = arith.mulf %2, %28 : vector<8x8xf32>
    %30 = arith.addf %24, %29 : vector<8x8xf32>
    %31 = vector.extract_strided_slice %0 {offsets = [16, 64], sizes = [12, 16], strides = [1, 1]} : vector<48x128xf32> to vector<12x16xf32>
    %32 = vector.extract_strided_slice %31 {offsets = [0, 0], sizes = [8, 16], strides = [1, 1]} : vector<12x16xf32> to vector<8x16xf32>
    %cst_8 = arith.constant dense<0.000000e+00> : vector<8x16xf32>
    %33 = tpu.matmul %30, %32, %cst_8 {dimension_numbers = #tpu.dot_dimension_numbers<[1], [0], [0], [1], [0, 0, 1, 1], [], []>} : vector<8x8xf32>, vector<8x16xf32>, vector<8x16xf32> -> vector<8x16xf32>
    %34 = vector.extract_strided_slice %31 {offsets = [8, 0], sizes = [4, 16], strides = [1, 1]} : vector<12x16xf32> to vector<4x16xf32>
    %cst_9 = arith.constant dense<0.000000e+00> : vector<8x16xf32>
    %35 = tpu.matmul %4, %34, %cst_9 {dimension_numbers = #tpu.dot_dimension_numbers<[1], [0], [0], [1], [0, 0, 1, 1], [], []>} : vector<8x4xf32>, vector<4x16xf32>, vector<8x16xf32> -> vector<8x16xf32>
    %36 = arith.addf %33, %35 : vector<8x16xf32>
    %37 = vector.extract_strided_slice %0 {offsets = [32, 96], sizes = [1, 16], strides = [1, 1]} : vector<48x128xf32> to vector<1x16xf32>
    %38 = vector.broadcast %37 : vector<1x16xf32> to vector<8x16xf32>
    %39 = arith.addf %36, %38 : vector<8x16xf32>
    %cst_10 = arith.constant 0.000000e+00 : f32
    %40 = vector.broadcast %cst_10 : f32 to vector<8x16xf32>
    %41 = arith.maximumf %39, %40 : vector<8x16xf32>
    %42 = vector.extract_strided_slice %0 {offsets = [16, 96], sizes = [16, 32], strides = [1, 1]} : vector<48x128xf32> to vector<16x32xf32>
    %cst_11 = arith.constant dense<0.000000e+00> : vector<8x32xf32>
    %43 = tpu.matmul %41, %42, %cst_11 {dimension_numbers = #tpu.dot_dimension_numbers<[1], [0], [0], [1], [0, 0, 1, 1], [], []>} : vector<8x16xf32>, vector<16x32xf32>, vector<8x32xf32> -> vector<8x32xf32>
    %44 = vector.extract_strided_slice %0 {offsets = [40, 0], sizes = [1, 32], strides = [1, 1]} : vector<48x128xf32> to vector<1x32xf32>
    %45 = vector.broadcast %44 : vector<1x32xf32> to vector<8x32xf32>
    %46 = arith.addf %43, %45 : vector<8x32xf32>
    %cst_12 = arith.constant 0.000000e+00 : f32
    %47 = vector.broadcast %cst_12 : f32 to vector<8x32xf32>
    %48 = arith.maximumf %46, %47 : vector<8x32xf32>
    %49 = vector.extract_strided_slice %0 {offsets = [0, 32], sizes = [32, 16], strides = [1, 1]} : vector<48x128xf32> to vector<32x16xf32>
    %cst_13 = arith.constant dense<0.000000e+00> : vector<8x16xf32>
    %50 = tpu.matmul %48, %49, %cst_13 {dimension_numbers = #tpu.dot_dimension_numbers<[1], [0], [0], [1], [0, 0, 1, 1], [], []>} : vector<8x32xf32>, vector<32x16xf32>, vector<8x16xf32> -> vector<8x16xf32>
    %51 = vector.extract_strided_slice %0 {offsets = [40, 32], sizes = [1, 16], strides = [1, 1]} : vector<48x128xf32> to vector<1x16xf32>
    %52 = vector.broadcast %51 : vector<1x16xf32> to vector<8x16xf32>
    %53 = arith.addf %50, %52 : vector<8x16xf32>
    %c0_14 = arith.constant 0 : index
    %c0_15 = arith.constant 0 : index
    %54 = vector.load %arg3[%c0_14, %c0_15] : memref<8x16xf32, #tpu.memory_space<vmem>>, vector<8x16xf32>
    tpu.vector_store %arg3[%c0_14, %c0_15], %53 {strides = array<i32>} : memref<8x16xf32, #tpu.memory_space<vmem>>, vector<8x16xf32>,
    %c0_16 = arith.constant 0 : index
    %c0_17 = arith.constant 0 : index
    %55 = vector.load %arg4[%c0_16, %c0_17] : memref<8x8xf32, #tpu.memory_space<vmem>>, vector<8x8xf32>
    tpu.vector_store %arg4[%c0_16, %c0_17], %24 {strides = array<i32>} : memref<8x8xf32, #tpu.memory_space<vmem>>, vector<8x8xf32>,
    %c0_18 = arith.constant 0 : index
    %c0_19 = arith.constant 0 : index
    %56 = vector.load %arg5[%c0_18, %c0_19] : memref<8x8xf32, #tpu.memory_space<vmem>>, vector<8x8xf32>
    tpu.vector_store %arg5[%c0_18, %c0_19], %25 {strides = array<i32>} : memref<8x8xf32, #tpu.memory_space<vmem>>, vector<8x8xf32>,
    return
  }
  func.func @transform_0(%arg0: i32) -> (i32, i32) {
    %c0_i32 = arith.constant 0 : i32
    %c0_i32_0 = arith.constant 0 : i32
    return %arg0, %c0_i32 : i32, i32
  }
  func.func @transform_1(%arg0: i32) -> (i32, i32) {
    %c0_i32 = arith.constant 0 : i32
    %c0_i32_0 = arith.constant 0 : i32
    %c0_i32_1 = arith.constant 0 : i32
    return %c0_i32, %c0_i32_0 : i32, i32
  }
  func.func @transform_2(%arg0: i32) -> (i32, i32) {
    %c0_i32 = arith.constant 0 : i32
    %c0_i32_0 = arith.constant 0 : i32
    return %arg0, %c0_i32 : i32, i32
  }
  func.func @transform_3(%arg0: i32) -> (i32, i32) {
    %c0_i32 = arith.constant 0 : i32
    %c0_i32_0 = arith.constant 0 : i32
    return %arg0, %c0_i32 : i32, i32
  }
  func.func @transform_4(%arg0: i32) -> (i32, i32) {
    %c0_i32 = arith.constant 0 : i32
    %c0_i32_0 = arith.constant 0 : i32
    return %arg0, %c0_i32 : i32, i32
  }
}

</mosaic_0001>

<bundles_post_ra>
// kernel: tpu_custom_call.1
= control target key start
LH: loop header
LB: loop body
LE: loop exit
PB: predicated region body
PF: predicated region fallthrough
CT: control target
= control target key end

     0   :  { %10 = vsyncpa [#allocation3], 0  ;;  %s1045_s0 = inlined_call_operand.hbm [shape: f32[8,28], index: 0, kind: input, shape index: {}]   ;;  %s1046_s1 = inlined_call_operand.hbm [shape: f32[48,128], index: 1, kind: input, shape index: {}]   ;;  %s1047_s2 = inlined_call_operand.hbm [shape: f32[8,16], index: 2, kind: output, shape index: {0}]   ;;  %s1048_s3 = inlined_call_operand.hbm [shape: f32[8,8], index: 3, kind: output, shape index: {1}]   ;;  %s1049_s4 = inlined_call_operand.hbm [shape: f32[8,8], index: 4, kind: output, shape index: {2}]  }
   0x1   :  { %11 = vsyncpa [#allocation6], 0 }
   0x2   :  { %12 = vsyncpa [#allocation4], 0 }
   0x3   :  { %13 = vsyncpa [#allocation9], 0  ;;  %s903_s15 = smov [#allocation2]   ;;  %s904_s17 = smov [#allocation5]  }
   0x4   :  { %s20_s16 = sshll.u32 %s903_s15, 4  ;;  %s29_s18 = sshll.u32 %s904_s17, 4  ;;  %s21_s16 = int_to_ptr.vmem [resolvable:$true] %s20_s16  ;;  %s30_s18 = int_to_ptr.vmem [resolvable:$true] %s29_s18 }
   0x5   :  { %s803_s19 = scalar_lea.vmem %s21_s16, 128  ;;  %p808_p1 = scmp.lt.s32.totalorder %s21_s16, %s21_s16 }
   0x6   :  { %p804_p0 = scmp.ne.s32.totalorder %s21_s16, %s803_s19  ;;  %p809_p2 = scmp.lt.s32.totalorder %s803_s19, %s803_s19 }
   0x8   :  { %p810_p3 = por %p809_p2, %p808_p1 }
   0xa   :  { %p811_p4 = pnand %p810_p3, %p804_p0 }
   0xc   :  { %814 = shalt.err (!%p811_p4)
}
   0xd   :  { %23 = dma.hbm_to_vmem [thread:$0]  %s1045_s0, 128, %s21_s16, [#allocation3]  }
   0xe   :  { %s823_s22 = scalar_lea.vmem %s30_s18, 768  ;;  %p828_p6 = scmp.lt.s32.totalorder %s30_s18, %s30_s18 }
   0xf   :  { %p824_p5 = scmp.ne.s32.totalorder %s30_s18, %s823_s22  ;;  %p829_p7 = scmp.lt.s32.totalorder %s823_s22, %s823_s22 }
  0x11   :  { %p830_p8 = por %p829_p7, %p828_p6 }
  0x13   :  { %p831_p9 = pnand %p830_p8, %p824_p5 }
  0x15   :  { %834 = shalt.err (!%p831_p9)
}
  0x16   :  { %s905_s23 = smov 128   ;;  %s906_s24 = smov 8  }
  0x17   :  { %35 = dma.hbm_to_vmem [thread:$0]  %s1046_s1, 768, %s30_s18, [#allocation6], %s905_s23, %s905_s23, %s906_s24  }
  0x18   :  { %895 = dma.done.wait [#allocation3], 128  }
  0x19   :  { %896 = vsyncadd [#allocation3], 4294967168 }
  0x1a   :  { %897 = dma.done.wait [#allocation6], 768  }
  0x1b   :  { %898 = vsyncadd [#allocation6], 4294966528  ;;  %v907_v0 = vmov 0.0   ;;  %vm908_vm0 = vmmov 0   ;;  %v954_v1 = vld [vmem:[#allocation5 + $0x8] sm:$0xff]  ;;  %v956_v2 = vld [vmem:[#allocation2] sm:$0xff]  ;;  %v49_v8 = vlaneseq }
  0x1c   :  { %726 = vmatprep.subr.mxu0 %v907_v0  ;;  %730 = vmatprep.mubr.msk.f32.mxu0 %vm908_vm0, %v907_v0  ;;  %s909_s0 = smov 64   ;;  %s910_s1 = smov 120   ;;  %v45_v3 = vld [vmem:[#allocation5 + $0x18] sm:$0xff]  ;;  %v962_v4 = vld [vmem:[#allocation5] sm:$0xff]  ;;  %vm64_vm1 = vcmask 130048   ;;  %v974_v10 = vld [vmem:[#allocation5 + $0x10] sm:$0xff] }
  0x1d   :  { %733 = vmatprep.subr.mxu1 %v907_v0  ;;  %741 = vmatprep.mubr.msk.f32.mxu1 %vm908_vm0, %v907_v0  ;;  %v972_v9 = vshrl.u32 %v49_v8, 7  ;;  %v46_v12 = vld [vmem:[#allocation5 + $0x20] sm:$0xff]  ;;  %s911_s27 = smov 96   ;;  %s912_s28 = smov 32   ;;  %vm142_vm2 = vcmask 261120   ;;  %vm393_vm3 = vcmask 64512  }
  0x1e   :  { %60 = vrot.lane.b32.xlu0 %v954_v1, %s909_s0  ;;  %54 = vrot.lane.b32.xlu1 %v956_v2, %s910_s1  ;;  %s913_s29 = smov 104   ;;  %vm316_vm4 = vcmask 1043456   ;;  %vm313_vm5 = vcmask 31744   ;;  %v47_v47 = vld [vmem:[#allocation5 + $0x28] sm:$0xff]  ;;  %s914_s30 = smov [#allocation8]  }
  0x1f   :  { %734 = vmatpush3.msra.mxu1 %v45_v3  ;;  %v51_v11 = vsub.s32 0, %v972_v9  ;;  %s668_s5 = sshll.u32 %s914_s30, 4  ;;  %s669_s5 = int_to_ptr.vmem [resolvable:$true] %s668_s5 }
  0x20   :  { %735 = vmatprep.subr.mxu1 %v907_v0  ;;  %s835_s6 = scalar_lea.vmem %s669_s5, 128  ;;  %p840_p11 = scmp.lt.s32.totalorder %s669_s5, %s669_s5 }
  0x21   :  { %736 = vmatpush3.msra.mxu1 %v974_v10  ;;  %v52_v13 = vrot.slane %v46_v12, %v51_v11  ;;  %v475_v48 = vrot.slane %v47_v47, %v51_v11  ;;  %p836_p10 = scmp.ne.s32.totalorder %s669_s5, %s835_s6  ;;  %p841_p12 = scmp.lt.s32.totalorder %s835_s6, %s835_s6 }
  0x22   :  { %58 = vrot.lane.b32.xlu0 %v962_v4, %s909_s0  ;;  %737 = vmatprep.subr.mxu1 %v907_v0 }
  0x23   :  { %738 = vmatpush3.msra.mxu1 %v954_v1  ;;  %139 = vrot.lane.b32.xlu1 %v52_v13, %s911_s27  ;;  %p842_p13 = por %p841_p12, %p840_p11 }
  0x24   :  { %739 = vmatprep.subr.mxu1 %v907_v0 }
  0x25   :  { %740 = vmatpush3.msra.mxu1 %v962_v4  ;;  %p843_p0 = pnand %p842_p13, %p836_p10 }
  0x26   :  { %756 = vmatprep.subr.mxu1 %v907_v0  ;;  %219 = vrot.lane.b32.xlu0 %v954_v1, %s912_s28 }
  0x27   :  { %217 = vrot.lane.b32.xlu1 %v962_v4, %s912_s28 }
  0x2a   :  { %223 = vrot.lane.b32.xlu0 %v52_v13, %s909_s0 }
  0x2e   :  { %311 = vrot.lane.b32.xlu0 %v45_v3, %s909_s0 }
  0x32   :  { %308 = vrot.lane.b32.xlu0 %v956_v2, %s913_s29 }
  0x36   :  { %478 = vrot.lane.b32.xlu0 %v45_v3, %s912_s28 }
  0x3a   :  { %562 = vrot.lane.b32.xlu0 %v45_v3, %s911_s27 }
  0x3e   :  { %558 = vrot.lane.b32.xlu0 %v954_v1, %s911_s27 }
  0x42   :  { %569 = vrot.lane.b32.xlu0 %v475_v48, %s911_s27 }
  0x90   :  { %v61_v5 = vpop.permute.xlu0 %60  ;;  %v55_v6 = vpop.permute.xlu1 %54 }
  0x91   :  { %727 = vmatpush3.msra.mxu0 %v61_v5 }
  0x92   :  { %728 = vmatprep.subr.mxu0 %v907_v0 }
  0x94   :  { %v59_v7 = vpop.permute.xlu0 %58 }
  0x95   :  { %729 = vmatpush3.msra.mxu0 %v59_v7  ;;  %v140_v18 = vpop.permute.xlu1 %139 }
  0x96   :  { %731 = vmatmul.mubr.msk.f32.vlgmr.msra.gmra.mxu0 %vm64_vm1, %v55_v6  ;;  %744 = vmatprep.subr.mxu0 %v907_v0 }
  0x97   :  { %748 = vmatprep.mubr.msk.f32.mxu0 %vm908_vm0, %v907_v0 }
  0x98   :  { %v220_v19 = vpop.permute.xlu0 %219 }
  0x99   :  { %745 = vmatpush3.msra.mxu0 %v220_v19  ;;  %v218_v20 = vpop.permute.xlu1 %217 }
  0x9a   :  { %746 = vmatprep.subr.mxu0 %v907_v0 }
  0x9b   :  { %747 = vmatpush3.msra.mxu0 %v218_v20 }
  0x9c   :  { %751 = vmatprep.subr.mxu0 %v907_v0  ;;  %v224_v25 = vpop.permute.xlu0 %223 }
  0xa0   :  { %v312_v31 = vpop.permute.xlu0 %311 }
  0xa4   :  { %v309_v32 = vpop.permute.xlu0 %308 }
  0xa8   :  { %v479_v45 = vpop.permute.xlu0 %478 }
  0xac   :  { %v563_v46 = vpop.permute.xlu0 %562 }
  0xb0   :  { %v559_v54 = vpop.permute.xlu0 %558 }
 0x156   :  { %v133_v14 = vpop.f32.mrf.mxu0 }
 0x157   :  { %v134_v15 = vadd.f32 %v133_v14, %v52_v13 }
 0x158   :  { %v732_v16 = vpop.f32.mrf.mxu0 }
 0x159   :  { %v137_v17 = vmax.f32 %v134_v15, 0.0 }
 0x15b   :  { %742 = vmatmul.mubr.msk.f32.vlgmr.msra.gmra.mxu1 %vm142_vm2, %v137_v17 }
 0x15c   :  { %758 = vmatprep.mubr.msk.f32.mxu1 %vm908_vm0, %v907_v0 }
 0x21b   :  { %v212_v21 = vpop.f32.mrf.mxu1 }
 0x21c   :  { %v213_v22 = vadd.f32 %v212_v21, %v140_v18 }
 0x21d   :  { %v743_v23 = vpop.f32.mrf.mxu1 }
 0x21e   :  { %v216_v24 = vmax.f32 %v213_v22, 0.0 }
 0x220   :  { %749 = vmatmul.mubr.msk.f32.vlgmr.msra.gmra.mxu0 %vm64_vm1, %v216_v24 }
 0x221   :  { %753 = vmatprep.mubr.msk.f32.mxu0 %vm908_vm0, %v907_v0  ;;  %752 = vmatpush3.msk.msra.mxu0 %vm316_vm4, %v312_v31 }
 0x222   :  { %761 = vmatprep.subr.mxu0 %v907_v0 }
 0x224   :  { %754 = vmatmul.mubr.msk.f32.vlgmr.msra.gmra.mxu0 %vm313_vm5, %v309_v32 }
 0x225   :  { %765 = vmatprep.mubr.msk.f32.mxu0 %vm908_vm0, %v907_v0  ;;  %762 = vmatpush3.msra.mxu0 %v479_v45 }
 0x226   :  { %763 = vmatprep.subr.mxu0 %v907_v0 }
 0x2e0   :  { %v295_v26 = vpop.f32.mrf.mxu0 }
 0x2e1   :  { %v296_v27 = vadd.f32 %v295_v26, %v224_v25 }
 0x2e2   :  { %v750_v28 = vpop.f32.mrf.mxu0 }
 0x2e3   :  { %v299_v29 = vmul.f32 0.5, %v296_v27  ;;  %646 = vst.msk [vmem:[#allocation8] sm:$0xff] %vm393_vm3, %v296_v27 }
 0x2e4   :  { %v385_v43 = vpop.f32.mrf.mxu0 }
 0x2e5   :  { %v300_v30 = vmul.f32 1.442695, %v299_v29 }
 0x2e6   :  { %v755_v44 = vpop.f32.mrf.mxu0 }
 0x2e7   :  { %793 = vpow2.f32 %v300_v30 }
 0x2f4   :  { %v794_v33 = vpop.eup %793 }
 0x2f5   :  { %303 = vrot.lane.b32.xlu1 %v794_v33, %s910_s1 }
 0x2f9   :  { %390 = vrot.lane.b32.xlu1 %v974_v10, %s909_s0 }
 0x2fd   :  { %467 = vrot.lane.b32.xlu1 %v52_v13, %s912_s28 }
 0x301   :  { %476 = vrot.lane.b32.xlu1 %v974_v10, %s912_s28 }
 0x305   :  { %560 = vrot.lane.b32.xlu1 %v974_v10, %s911_s27 }
 0x309   :  { %556 = vrot.lane.b32.xlu1 %v962_v4, %s911_s27 }
 0x30d   :  { %648 = vrot.lane.b32.xlu1 %v296_v27, %s910_s1 }
 0x367   :  { %v304_v34 = vpop.permute.xlu1 %303 }
 0x368   :  { %v306_v35 = vmul.f32 %v304_v34, %v956_v2 }
 0x36a   :  { %v307_v36 = vadd.f32 %v306_v35, %v296_v27 }
 0x36b   :  { %v391_v37 = vpop.permute.xlu1 %390 }
 0x36c   :  { %757 = vmatpush3.msra.mxu1 %v391_v37 }
 0x36d   :  { %759 = vmatmul.mubr.msk.f32.vlgmr.msra.gmra.mxu1 %vm393_vm3, %v307_v36  ;;  %768 = vmatprep.subr.mxu1 %v907_v0 }
 0x36e   :  { %776 = vmatprep.mubr.msk.f32.mxu1 %vm908_vm0, %v907_v0  ;;  %769 = vmatpush3.msra.mxu1 %v563_v46 }
 0x36f   :  { %v468_v38 = vpop.permute.xlu1 %467  ;;  %770 = vmatprep.subr.mxu1 %v907_v0 }
 0x373   :  { %v477_v39 = vpop.permute.xlu1 %476 }
 0x374   :  { %764 = vmatpush3.msra.mxu0 %v477_v39 }
 0x377   :  { %v561_v40 = vpop.permute.xlu1 %560 }
 0x378   :  { %771 = vmatpush3.msra.mxu1 %v561_v40 }
 0x379   :  { %772 = vmatprep.subr.mxu1 %v907_v0 }
 0x37a   :  { %773 = vmatpush3.msra.mxu1 %v559_v54 }
 0x37b   :  { %v557_v41 = vpop.permute.xlu1 %556  ;;  %774 = vmatprep.subr.mxu1 %v907_v0 }
 0x37c   :  { %775 = vmatpush3.msra.mxu1 %v557_v41 }
 0x37f   :  { %v649_v42 = vpop.permute.xlu1 %648 }
 0x380   :  { %651 = vst.msk [vmem:[#allocation10] sm:$0xff] %vm393_vm3, %v649_v42 }
 0x42d   :  { %v463_v49 = vpop.f32.mrf.mxu1 }
 0x42e   :  { %v464_v50 = vadd.f32 %v463_v49, %v385_v43 }
 0x42f   :  { %v760_v51 = vpop.f32.mrf.mxu1 }
 0x430   :  { %v470_v52 = vadd.f32 %v468_v38, %v464_v50 }
 0x432   :  { %v471_v53 = vmax.f32 %v470_v52, 0.0 }
 0x434   :  { %766 = vmatmul.mubr.msk.f32.vlgmr.msra.gmra.mxu0 %vm64_vm1, %v471_v53 }
 0x4f4   :  { %v551_v55 = vpop.f32.mrf.mxu0 }
 0x4f5   :  { %v552_v56 = vadd.f32 %v551_v55, %v475_v48 }
 0x4f6   :  { %v767_v57 = vpop.f32.mrf.mxu0 }
 0x4f7   :  { %v555_v58 = vmax.f32 %v552_v56, 0.0 }
 0x4f9   :  { %777 = vmatmul.mubr.msk.f32.vlgmr.msra.gmra.mxu1 %vm142_vm2, %v555_v58 }
 0x4fa   :  { %846 = shalt.err (!%p843_p0)
}
 0x4fb   :  { %671 = dma.vmem_to_hbm [thread:$0]  %s669_s5, 128, %s1048_s3, [#allocation9]  }
 0x4fc   :  { %s915_s9 = smov [#allocation10]  }
 0x4fd   :  { %s678_s10 = sshll.u32 %s915_s9, 4  ;;  %s679_s10 = int_to_ptr.vmem [resolvable:$true] %s678_s10 }
 0x4fe   :  { %s855_s11 = scalar_lea.vmem %s679_s10, 128  ;;  %p860_p2 = scmp.lt.s32.totalorder %s679_s10, %s679_s10 }
 0x4ff   :  { %p856_p1 = scmp.ne.s32.totalorder %s679_s10, %s855_s11  ;;  %p861_p3 = scmp.lt.s32.totalorder %s855_s11, %s855_s11 }
 0x501   :  { %p862_p4 = por %p861_p3, %p860_p2 }
 0x503   :  { %p863_p5 = pnand %p862_p4, %p856_p1 }
 0x505   :  { %866 = shalt.err (!%p863_p5)
}
 0x506   :  { %681 = dma.vmem_to_hbm [thread:$0]  %s679_s10, 128, %s1049_s4, [#allocation9]   ;;  %v570_v59 = vpop.permute.xlu0 %569 }
 0x507   :  { %s916_s14 = smov [#allocation7]  }
 0x508   :  { %s658_s15 = sshll.u32 %s916_s14, 4  ;;  %s659_s15 = int_to_ptr.vmem [resolvable:$true] %s658_s15 }
 0x509   :  { %s875_s3 = scalar_lea.vmem %s659_s15, 128  ;;  %p880_p7 = scmp.lt.s32.totalorder %s659_s15, %s659_s15 }
 0x50a   :  { %p876_p6 = scmp.ne.s32.totalorder %s659_s15, %s875_s3  ;;  %p881_p8 = scmp.lt.s32.totalorder %s875_s3, %s875_s3 }
 0x50c   :  { %p882_p9 = por %p881_p8, %p880_p7 }
 0x50e   :  { %p883_p10 = pnand %p882_p9, %p876_p6 }
 0x5b9   :  { %v641_v60 = vpop.f32.mrf.mxu1 }
 0x5ba   :  { %v642_v61 = vadd.f32 %v641_v60, %v570_v59 }
 0x5bb   :  { %v778_v62 = vpop.f32.mrf.mxu1 }
 0x5bc   :  { %645 = vst.msk [vmem:[#allocation7] sm:$0xff] %vm64_vm1, %v642_v61 }
 0x5bd   :  { %886 = shalt.err (!%p883_p10)
}
 0x5be   :  { %661 = dma.vmem_to_hbm [thread:$0]  %s659_s15, 128, %s1047_s2, [#allocation4]  }
 0x5bf   :  { %899 = dma.done.wait [#allocation4], 128  }
 0x5c0   :  { %900 = vsyncadd [#allocation4], 4294967168 }
 0x5c1   :  { %901 = dma.done.wait [#allocation9], 256  }
 0x5c2   :  { %902 = vsyncadd [#allocation9], 4294967040 }
 0x5c3   :  { %691 = vsyncpa [#allocation3], 1 }
 0x5c4   :  { %692 = vsyncpa [#allocation6], 1 }
 0x5c5   :  { %693 = vsyncpa [#allocation4], 1 }
 0x5c6   :  { %694 = vsyncpa [#allocation9], 1 }

</bundles_post_ra>
